<compile_context>
chip_gen: v7x
topology: tpu7x:2x2x1
jax: 0.10.0
libtpu: 0.0.40
codegen_flags: <defaults>
</compile_context>

<pallas_src>
import functools

import jax
import jax.numpy as jnp
from jax.experimental import pallas as pl
from jax.experimental.pallas import tpu as pltpu


def _round_up(v, m):
    return ((v + m - 1) // m) * m


def _device_kind():
    try:
        return jax.devices()[0].device_kind.lower()
    except Exception:  # pragma: no cover - defensive, e.g. no devices yet
        return ""


def _pnn_kernel(x_ref, x2_ref, xt_ref, t2_ref, mask_ref, out_ref, acc_ref, *,
                tn, mask_resident):
    # x_ref    : (TB, D)         query-sample tile
    # x2_ref   : (TB, 1)         s * ||x||^2 for this B tile (precomputed on host)
    # xt_ref   : (D, TN)         training samples, transposed & pre-scaled by 2s
    # t2_ref   : (1, TN)         s * ||train||^2 for this N tile
    # mask_ref : (TN, C) or (Np, C) one-hot class membership * 1/count
    # out_ref  : (1, TB)         int32 argmax class index (lane-dense)
    # acc_ref  : (TB, C)         f32 class-score accumulator (VMEM scratch)
    k = pl.program_id(1)

    @pl.when(k == 0)
    def _():
        acc_ref[...] = jnp.zeros_like(acc_ref)

    # xy = 2s * x.t  (scale folded into xt on the host); s = 1/(2 sigma^2).
    xy = jnp.dot(x_ref[...], xt_ref[...],
                 preferred_element_type=jnp.float32)              # (TB, TN)
    # arg = -s * ||x - t||^2.  No clamp: rounding can make it a few ulp
    # positive, exp of which is harmless and saves a VPU pass.
    arg = xy - x2_ref[...] - t2_ref[...]
    pattern = jnp.exp(arg.astype(mask_ref.dtype))                 # (TB, TN)

    if mask_resident:
        # Whole (Np, C) mask resident in VMEM; slice this step's TN rows.
        m = mask_ref[pl.ds(pl.multiple_of(k * tn, tn), tn), :]
    else:
        m = mask_ref[...]
    acc_ref[...] += jnp.dot(pattern, m,
                            preferred_element_type=jnp.float32)   # (TB, C)

    @pl.when(k == pl.num_programs(1) - 1)
    def _():
        out_ref[...] = jnp.argmax(acc_ref[...], axis=1).astype(jnp.int32)[None, :]


def pnn_forward(x_test, x_train, y_train, sigma, *, num_classes=None,
                tb=None, tn=512, pattern_dtype=None, mask_resident=None):
    """JAX/Pallas equivalent of PNN.forward (returns int32 class predictions).

    num_classes should be passed explicitly when tracing under jit (the
    fallback reads jnp.max(y_train), which forces a device sync).
    pattern_dtype / tb default per chip generation: bf16 + TB=256 on v6e/v7x,
    f32 + TB=128 on v5e and older.
    """
    x_test = jnp.asarray(x_test, jnp.float32)
    x_train = jnp.asarray(x_train, jnp.float32)
    y_train = jnp.asarray(y_train, jnp.int32)

    kind = _device_kind()
    newer_gen = any(s in kind for s in ("v6", "v7", "7x"))   # bf16 EUP/VPU chips
    is_v7 = ("v7" in kind) or ("7x" in kind)

    if pattern_dtype is None:
        pattern_dtype = jnp.bfloat16 if newer_gen else jnp.float32
    if tb is None:
        tb = 256 if newer_gen else 128

    if num_classes is None:
        # NOTE: forces a device sync; pass num_classes explicitly under jit.
        num_classes = int(jnp.max(y_train)) + 1   # matches torch F.one_hot
    C = num_classes

    B, D = x_test.shape
    N, _ = x_train.shape

    inv_two_sigma2 = 1.0 / (2.0 * float(sigma) ** 2)

    # One-hot membership with 1/count folded in.  Counts are clamped to >= 1
    # so an empty class yields a score of 0 instead of NaN.
    mask = jax.nn.one_hot(y_train, C, dtype=jnp.float32)             # (N, C)
    counts = jnp.maximum(jnp.sum(mask, axis=0, keepdims=True), 1.0)
    mask_w = (mask / counts).astype(pattern_dtype)                   # (N, C)

    # Tile sizes: TB multiple of 8 (sublanes), TN multiple of 128 (lanes).
    TB = tb if B >= tb else _round_up(B, 8)
    TN = tn if N >= tn else _round_up(N, 128)
    Bp = _round_up(B, TB)
    Np = _round_up(N, TN)

    # v7x megacore: if the whole batch lands in one B tile and TB can be split
    # into two lane-aligned tiles, halve TB so both TensorCores get work.
    if is_v7 and Bp // TB == 1 and TB % 256 == 0:
        TB //= 2
        Bp = _round_up(B, TB)

    x_test_p = jnp.pad(x_test, ((0, Bp - B), (0, 0)))
    x_train_p = jnp.pad(x_train, ((0, Np - N), (0, 0)))
    mask_p = jnp.pad(mask_w, ((0, Np - N), (0, 0)))

    # i-only / k-only terms precomputed on the host (hoisted out of the k loop):
    #   xt_scaled = 2s * x_train.T          (D, Np)
    #   x2_scaled = s * ||x||^2             (Bp, 1)
    #   t2_scaled = s * ||t||^2             (1, Np)
    xt_scaled = x_train_p.T * (2.0 * inv_two_sigma2)
    x2_scaled = inv_two_sigma2 * jnp.sum(x_test_p * x_test_p, axis=1,
                                         keepdims=True)              # (Bp, 1)
    t2_scaled = (inv_two_sigma2 *
                 jnp.sum(x_train_p * x_train_p, axis=1))[None, :]    # (1, Np)

    # Small-C mask: keep the whole (Np, C) array resident in VMEM (constant
    # index_map, loaded once) when its lane-padded footprint is small;
    # otherwise stream a (TN, C) tile per reduction step.
    if mask_resident is None:
        lane_padded_bytes = Np * max(C, 128) * jnp.dtype(pattern_dtype).itemsize
        mask_resident = lane_padded_bytes <= (4 << 20)

    if mask_resident:
        mask_spec = pl.BlockSpec((Np, C), lambda i, k: (0, 0))
    else:
        mask_spec = pl.BlockSpec((TN, C), lambda i, k: (k, 0))

    grid = (Bp // TB, Np // TN)
    kernel = functools.partial(_pnn_kernel, tn=TN, mask_resident=mask_resident)

    cost = pl.CostEstimate(
        flops=int(2 * Bp * Np * (D + C)),
        transcendentals=int(Bp * Np),
        bytes_accessed=int(4 * (Bp * D + Np * D + Bp + Np)
                           + jnp.dtype(pattern_dtype).itemsize * Np * C
                           + 4 * Bp),
    )

    out = pl.pallas_call(
        kernel,
        out_shape=jax.ShapeDtypeStruct((1, Bp), jnp.int32),
        grid_spec=pltpu.PrefetchScalarGridSpec(
            num_scalar_prefetch=0,
            grid=grid,
            in_specs=[
                pl.BlockSpec((TB, D), lambda i, k: (i, 0)),   # x_test tile
                pl.BlockSpec((TB, 1), lambda i, k: (i, 0)),   # s*||x||^2 column
                pl.BlockSpec((D, TN), lambda i, k: (0, k)),   # 2s * x_train.T tile
                pl.BlockSpec((1, TN), lambda i, k: (0, k)),   # s*||t||^2 row
                mask_spec,                                    # weighted one-hot mask
            ],
            out_specs=pl.BlockSpec((1, TB), lambda i, k: (0, i)),
            scratch_shapes=[pltpu.VMEM((TB, C), jnp.float32)],
        ),
        compiler_params=pltpu.CompilerParams(
            dimension_semantics=("parallel", "arbitrary"),
            vmem_limit_bytes=(48 << 20) if is_v7 else (64 << 20),
        ),
        cost_estimate=cost,
    )(x_test_p, x2_scaled, xt_scaled, t2_scaled, mask_p)

    return out[0, :B]   # (B,) int32 class predictions


def pnn_reference(x_test, x_train, y_train, sigma, num_classes=None):
    """Pure-JAX reference of the PyTorch PNN forward."""
    if num_classes is None:
        num_classes = int(jnp.max(y_train)) + 1
    d2 = jnp.sum((x_test[:, None, :] - x_train[None, :, :]) ** 2, axis=-1)
    pattern = jnp.exp(-d2 / (2.0 * float(sigma) ** 2))
    mask = jax.nn.one_hot(y_train, num_classes, dtype=jnp.float32)   # (N, C)
    summ = pattern @ mask / jnp.maximum(jnp.sum(mask, axis=0), 1.0)
    return jnp.argmax(summ, axis=1).astype(jnp.int32)


if __name__ == "__main__":
    key = jax.random.PRNGKey(0)
    k1, k2, k3, k4 = jax.random.split(key, 4)

    # Test 1: small case, f32 pattern path, resident mask (exact match).
    B, N, D, C = 8, 32, 16, 4
    sigma = 0.7
    x_train = jax.random.normal(k1, (N, D), dtype=jnp.float32)
    y_train = jnp.arange(N, dtype=jnp.int32) % C      # covers all C classes
    x_test = jax.random.normal(k2, (B, D), dtype=jnp.float32)

    preds = jax.block_until_ready(
        pnn_forward(x_test, x_train, y_train, sigma, num_classes=C,
                    pattern_dtype=jnp.float32))
    ref = pnn_reference(x_test, x_train, y_train, sigma, num_classes=C)
    assert preds.shape == (B,)
    assert bool(jnp.all(preds == ref)), (preds, ref)

    # Test 2: ragged sizes that exercise the B/N tile padding paths.
    B2, N2, D2, C2 = 10, 37, 5, 3
    sigma2 = 1.3
    x_train2 = jax.random.normal(k3, (N2, D2), dtype=jnp.float32)
    y_train2 = jnp.arange(N2, dtype=jnp.int32) % C2
    x_test2 = jax.random.normal(k4, (B2, D2), dtype=jnp.float32)

    preds2 = jax.block_until_ready(
        pnn_forward(x_test2, x_train2, y_train2, sigma2, num_classes=C2,
                    pattern_dtype=jnp.float32))
    ref2 = pnn_reference(x_test2, x_train2, y_train2, sigma2, num_classes=C2)
    assert preds2.shape == (B2,)
    assert bool(jnp.all(preds2 == ref2)), (preds2, ref2)

    # Test 3: force the streamed-mask path (mask_resident=False), f32.
    preds3 = jax.block_until_ready(
        pnn_forward(x_test, x_train, y_train, sigma, num_classes=C,
                    pattern_dtype=jnp.float32, mask_resident=False))
    assert bool(jnp.all(preds3 == ref)), (preds3, ref)

    # Test 4: chip-default path (bf16 pattern/mask on v6e/v7x, f32 elsewhere).
    # bf16 exp/accumulation may resolve exact near-ties differently from the
    # f32 reference, so only structural checks here.
    preds4 = jax.block_until_ready(
        pnn_forward(x_test, x_train, y_train, sigma, num_classes=C))
    assert preds4.shape == (B,)
    assert preds4.dtype == jnp.int32
    assert bool(jnp.all((preds4 >= 0) & (preds4 < C)))

    print("KERNEL_OK")
</pallas_src>

<mosaic_0001>
module attributes {stable_mosaic.version = 11 : i64} {
  func.func @_pnn_kernel(%arg0: i32, %arg1: i32, %arg2: memref<8x16xf32, #tpu.memory_space<vmem>>, %arg3: memref<8x1xf32, #tpu.memory_space<vmem>>, %arg4: memref<16x128xf32, #tpu.memory_space<vmem>>, %arg5: memref<1x128xf32, #tpu.memory_space<vmem>>, %arg6: memref<128x4xf32, #tpu.memory_space<vmem>>, %arg7: memref<1x8xi32, #tpu.memory_space<vmem>>, %arg8: memref<8x4xf32, #tpu.memory_space<vmem>>) attributes {dimension_semantics = [#tpu.dimension_semantics<parallel>, #tpu.dimension_semantics<arbitrary>], iteration_bounds = array<i64: 1, 1>, scalar_prefetch = 0 : i64, scratch_operands = 1 : i64, tpu.core_type = #tpu.core_type<tc>, window_params = [{transform_indices = @transform_0, window_bounds = array<i64: 8, 16>}, {transform_indices = @transform_1, window_bounds = array<i64: 8, 1>}, {transform_indices = @transform_2, window_bounds = array<i64: 16, 128>}, {transform_indices = @transform_3, window_bounds = array<i64: 1, 128>}, {pipeline_mode = #tpu.pipeline_mode<synchronous>, transform_indices = @transform_4, window_bounds = array<i64: 128, 4>}, {transform_indices = @transform_5, window_bounds = array<i64: 1, 8>}]} {
    %c0_i32 = arith.constant 0 : i32
    %0 = arith.cmpi eq, %arg1, %c0_i32 : i32
    %1 = arith.extui %0 : i1 to i32
    %c0_i32_0 = arith.constant 0 : i32
    %2 = arith.cmpi ne, %1, %c0_i32_0 : i32
    scf.if %2 {
      %cst_16 = arith.constant 0.000000e+00 : f32
      %24 = vector.broadcast %cst_16 : f32 to vector<8x4xf32>
      %c0_17 = arith.constant 0 : index
      %c0_18 = arith.constant 0 : index
      %25 = vector.load %arg8[%c0_17, %c0_18] : memref<8x4xf32, #tpu.memory_space<vmem>>, vector<8x4xf32>
      tpu.vector_store %arg8[%c0_17, %c0_18], %24 {strides = array<i32>} : memref<8x4xf32, #tpu.memory_space<vmem>>, vector<8x4xf32>,
    } else {
    }
    %c0 = arith.constant 0 : index
    %c0_1 = arith.constant 0 : index
    %3 = vector.load %arg2[%c0, %c0_1] : memref<8x16xf32, #tpu.memory_space<vmem>>, vector<8x16xf32>
    %c0_2 = arith.constant 0 : index
    %c0_3 = arith.constant 0 : index
    %4 = vector.load %arg4[%c0_2, %c0_3] : memref<16x128xf32, #tpu.memory_space<vmem>>, vector<16x128xf32>
    %cst = arith.constant dense<0.000000e+00> : vector<8x128xf32>
    %5 = tpu.matmul %3, %4, %cst {dimension_numbers = #tpu.dot_dimension_numbers<[1], [0], [0], [1], [0, 0, 1, 1], [], []>} : vector<8x16xf32>, vector<16x128xf32>, vector<8x128xf32> -> vector<8x128xf32>
    %c0_4 = arith.constant 0 : index
    %c0_5 = arith.constant 0 : index
    %6 = vector.load %arg3[%c0_4, %c0_5] : memref<8x1xf32, #tpu.memory_space<vmem>>, vector<8x1xf32>
    %7 = vector.broadcast %6 : vector<8x1xf32> to vector<8x128xf32>
    %8 = arith.subf %5, %7 : vector<8x128xf32>
    %c0_6 = arith.constant 0 : index
    %c0_7 = arith.constant 0 : index
    %9 = vector.load %arg5[%c0_6, %c0_7] : memref<1x128xf32, #tpu.memory_space<vmem>>, vector<1x128xf32>
    %10 = vector.broadcast %9 : vector<1x128xf32> to vector<8x128xf32>
    %11 = arith.subf %8, %10 : vector<8x128xf32>
    %12 = math.exp %11 : vector<8x128xf32>
    %c128_i32 = arith.constant 128 : i32
    %13 = arith.muli %arg1, %c128_i32 : i32
    %14 = tpu.assume_multiple %13, 128 : i32
    %15 = arith.index_cast %14 : i32 to index
    %c0_8 = arith.constant 0 : index
    %16 = vector.load %arg6[%15, %c0_8] : memref<128x4xf32, #tpu.memory_space<vmem>>, vector<128x4xf32>
    %c0_9 = arith.constant 0 : index
    %c0_10 = arith.constant 0 : index
    %17 = vector.load %arg8[%c0_9, %c0_10] : memref<8x4xf32, #tpu.memory_space<vmem>>, vector<8x4xf32>
    %cst_11 = arith.constant dense<0.000000e+00> : vector<8x4xf32>
    %18 = tpu.matmul %12, %16, %cst_11 {dimension_numbers = #tpu.dot_dimension_numbers<[1], [0], [0], [1], [0, 0, 1, 1], [], []>} : vector<8x128xf32>, vector<128x4xf32>, vector<8x4xf32> -> vector<8x4xf32>
    %19 = arith.addf %17, %18 : vector<8x4xf32>
    %c0_12 = arith.constant 0 : index
    %c0_13 = arith.constant 0 : index
    %20 = vector.load %arg8[%c0_12, %c0_13] : memref<8x4xf32, #tpu.memory_space<vmem>>, vector<8x4xf32>
    tpu.vector_store %arg8[%c0_12, %c0_13], %19 {strides = array<i32>} : memref<8x4xf32, #tpu.memory_space<vmem>>, vector<8x4xf32>,
    %c0_i32_14 = arith.constant 0 : i32
    %21 = arith.cmpi eq, %arg1, %c0_i32_14 : i32
    %22 = arith.extui %21 : i1 to i32
    %c0_i32_15 = arith.constant 0 : i32
    %23 = arith.cmpi ne, %22, %c0_i32_15 : i32
    scf.if %23 {
      %c0_16 = arith.constant 0 : index
      %c0_17 = arith.constant 0 : index
      %24 = vector.load %arg8[%c0_16, %c0_17] : memref<8x4xf32, #tpu.memory_space<vmem>>, vector<8x4xf32>
      %25 = tpu.reduce_index %24 {axis = 1 : i32, kind = #tpu.reduction_kind<arg_max>} : vector<8x4xf32> -> vector<8xi32>
      %26 = vector.shape_cast %25 : vector<8xi32> to vector<1x8xi32>
      %c0_18 = arith.constant 0 : index
      %c0_19 = arith.constant 0 : index
      %27 = vector.load %arg7[%c0_18, %c0_19] : memref<1x8xi32, #tpu.memory_space<vmem>>, vector<1x8xi32>
      tpu.vector_store %arg7[%c0_18, %c0_19], %26 {strides = array<i32>} : memref<1x8xi32, #tpu.memory_space<vmem>>, vector<1x8xi32>,
    } else {
    }
    return
  }
  func.func @transform_0(%arg0: i32, %arg1: i32) -> (i32, i32) {
    %c0_i32 = arith.constant 0 : i32
    %c0_i32_0 = arith.constant 0 : i32
    return %arg0, %c0_i32 : i32, i32
  }
  func.func @transform_1(%arg0: i32, %arg1: i32) -> (i32, i32) {
    %c0_i32 = arith.constant 0 : i32
    %c0_i32_0 = arith.constant 0 : i32
    return %arg0, %c0_i32 : i32, i32
  }
  func.func @transform_2(%arg0: i32, %arg1: i32) -> (i32, i32) {
    %c0_i32 = arith.constant 0 : i32
    %c0_i32_0 = arith.constant 0 : i32
    return %c0_i32, %arg1 : i32, i32
  }
  func.func @transform_3(%arg0: i32, %arg1: i32) -> (i32, i32) {
    %c0_i32 = arith.constant 0 : i32
    %c0_i32_0 = arith.constant 0 : i32
    return %c0_i32, %arg1 : i32, i32
  }
  func.func @transform_4(%arg0: i32, %arg1: i32) -> (i32, i32) {
    %c0_i32 = arith.constant 0 : i32
    %c0_i32_0 = arith.constant 0 : i32
    %c0_i32_1 = arith.constant 0 : i32
    return %c0_i32, %c0_i32_0 : i32, i32
  }
  func.func @transform_5(%arg0: i32, %arg1: i32) -> (i32, i32) {
    %c0_i32 = arith.constant 0 : i32
    %c0_i32_0 = arith.constant 0 : i32
    return %c0_i32, %arg0 : i32, i32
  }
}

</mosaic_0001>

<bundles_post_ra>
// kernel: tpu_custom_call.1
= control target key start
LH: loop header
LB: loop body
LE: loop exit
PB: predicated region body
PF: predicated region fallthrough
CT: control target
= control target key end

     0   :  { %10 = vsyncpa [#allocation4], 0  ;;  %s677_s0 = inlined_call_operand.hbm [shape: f32[8,16], index: 0, kind: input, shape index: {}]   ;;  %s678_s1 = inlined_call_operand.hbm [shape: f32[8,1], index: 1, kind: input, shape index: {}]   ;;  %s679_s2 = inlined_call_operand.hbm [shape: f32[16,128], index: 2, kind: input, shape index: {}]   ;;  %s680_s3 = inlined_call_operand.hbm [shape: f32[1,128], index: 3, kind: input, shape index: {}]   ;;  %s681_s4 = inlined_call_operand.hbm [shape: f32[128,4], index: 4, kind: input, shape index: {}]   ;;  %s682_s5 = inlined_call_operand.hbm [shape: s32[1,8], index: 5, kind: output, shape index: {}]  }
   0x1   :  { %11 = vsyncpa [#allocation7], 0 }
   0x2   :  { %12 = vsyncpa [#allocation10], 0 }
   0x3   :  { %13 = vsyncpa [#allocation5], 0  ;;  %s553_s18 = smov [#allocation6]   ;;  %s554_s20 = smov [#allocation9]  }
   0x4   :  { %s30_s19 = sshll.u32 %s553_s18, 4  ;;  %s52_s21 = sshll.u32 %s554_s20, 4  ;;  %s31_s19 = int_to_ptr.vmem [resolvable:$true] %s30_s19  ;;  %s53_s21 = int_to_ptr.vmem [resolvable:$true] %s52_s21 }
   0x5   :  { %s413_s24 = scalar_lea.hbm %s678_s1, 128 }
   0x6   :  { %p414_p0 = scmp.ne.s32.totalorder %s678_s1, %s413_s24  ;;  %p417_p1 = scmp.lt.u32.totalorder %s413_s24, %s678_s1 }
   0x8   :  { %p419_p2 = pnand %p417_p1, %p414_p0 }
   0xa   :  { %422 = shalt.err (!%p419_p2)
}
   0xb   :  { %s423_s29 = scalar_lea.vmem %s31_s19, 128  ;;  %p428_p4 = scmp.lt.s32.totalorder %s31_s19, %s31_s19 }
   0xc   :  { %p424_p3 = scmp.ne.s32.totalorder %s31_s19, %s423_s29  ;;  %p429_p5 = scmp.lt.s32.totalorder %s423_s29, %s423_s29 }
   0xe   :  { %p430_p6 = por %p429_p5, %p428_p4 }
  0x10   :  { %p431_p7 = pnand %p430_p6, %p424_p3 }
  0x12   :  { %434 = shalt.err (!%p431_p7)
}
  0x13   :  { %33 = dma.hbm_to_vmem [thread:$0]  %s678_s1, 128, %s31_s19, [#allocation7]  }
  0x14   :  { %s435_s9 = scalar_lea.hbm %s680_s3, 16 }
  0x15   :  { %p436_p8 = scmp.ne.s32.totalorder %s680_s3, %s435_s9  ;;  %p439_p9 = scmp.lt.u32.totalorder %s435_s9, %s680_s3 }
  0x17   :  { %p441_p10 = pnand %p439_p9, %p436_p8 }
  0x19   :  { %444 = shalt.err (!%p441_p10)
}
  0x1a   :  { %s445_s14 = scalar_lea.vmem %s53_s21, 16  ;;  %s449_s15 = scalar_lea.vmem %s53_s21, 32 }
  0x1b   :  { %p446_p11 = scmp.ne.s32.totalorder %s53_s21, %s445_s14  ;;  %p450_p12 = scmp.lt.s32.totalorder %s53_s21, %s53_s21 }
  0x1c   :  { %p451_p13 = scmp.lt.s32.totalorder %s449_s15, %s445_s14 }
  0x1e   :  { %p452_p0 = por %p451_p13, %p450_p12 }
  0x20   :  { %p453_p1 = pnand %p452_p0, %p446_p11 }
  0x22   :  { %456 = shalt.err (!%p453_p1)
}
  0x23   :  { %55 = dma.hbm_to_vmem [thread:$0]  %s680_s3, 16, %s53_s21, [#allocation10]  }
  0x24   :  { %s555_s17 = smov [#allocation3]   ;;  %s556_s19 = smov [#allocation8]  }
  0x25   :  { %s20_s18 = sshll.u32 %s555_s17, 4  ;;  %s39_s20 = sshll.u32 %s556_s19, 4  ;;  %s21_s18 = int_to_ptr.vmem [resolvable:$true] %s20_s18  ;;  %s619_s20 = int_to_ptr.vmem [resolvable:$true] %s39_s20 }
  0x26   :  { %s457_s24 = scalar_lea.hbm %s677_s0, 128 }
  0x27   :  { %p458_p2 = scmp.ne.s32.totalorder %s677_s0, %s457_s24  ;;  %p461_p3 = scmp.lt.u32.totalorder %s457_s24, %s677_s0 }
  0x29   :  { %p463_p4 = pnand %p461_p3, %p458_p2 }
  0x2b   :  { %466 = shalt.err (!%p463_p4)
}
  0x2c   :  { %s467_s3 = scalar_lea.vmem %s21_s18, 128  ;;  %p472_p6 = scmp.lt.s32.totalorder %s21_s18, %s21_s18 }
  0x2d   :  { %p468_p5 = scmp.ne.s32.totalorder %s21_s18, %s467_s3  ;;  %p473_p7 = scmp.lt.s32.totalorder %s467_s3, %s467_s3 }
  0x2f   :  { %p474_p8 = por %p473_p7, %p472_p6 }
  0x31   :  { %p475_p9 = pnand %p474_p8, %p468_p5 }
  0x33   :  { %478 = shalt.err (!%p475_p9)
}
  0x34   :  { %23 = dma.hbm_to_vmem [thread:$0]  %s677_s0, 128, %s21_s18, [#allocation4]  }
  0x35   :  { %s479_s7 = scalar_lea.hbm %s679_s2, 256 }
  0x36   :  { %p480_p10 = scmp.ne.s32.totalorder %s679_s2, %s479_s7  ;;  %p483_p11 = scmp.lt.u32.totalorder %s479_s7, %s679_s2 }
  0x38   :  { %p485_p12 = pnand %p483_p11, %p480_p10 }
  0x3a   :  { %488 = shalt.err (!%p485_p12)
}
  0x3b   :  { %s489_s12 = scalar_lea.vmem %s619_s20, 256  ;;  %p494_p0 = scmp.lt.s32.totalorder %s619_s20, %s619_s20 }
  0x3c   :  { %p490_p13 = scmp.ne.s32.totalorder %s619_s20, %s489_s12  ;;  %p495_p1 = scmp.lt.s32.totalorder %s489_s12, %s489_s12 }
  0x3e   :  { %p496_p2 = por %p495_p1, %p494_p0 }
  0x40   :  { %p497_p3 = pnand %p496_p2, %p490_p13 }
  0x42   :  { %500 = shalt.err (!%p497_p3)
}
  0x43   :  { %s557_s0 = smov 128   ;;  %s558_s13 = smov 8  }
  0x44   :  { %45 = dma.hbm_to_vmem [thread:$0]  %s679_s2, 256, %s619_s20, [#allocation7], %s557_s0, %s557_s0, %s558_s13  }
  0x45   :  { %s559_s1 = smov [#allocation11]   ;;  %s501_s19 = scalar_lea.hbm %s681_s4, 2048 }
  0x46   :  { %s61_s16 = sshll.u32 %s559_s1, 4  ;;  %p502_p4 = scmp.ne.s32.totalorder %s681_s4, %s501_s19  ;;  %s62_s16 = int_to_ptr.vmem [resolvable:$true] %s61_s16 }
  0x47   :  { %p505_p5 = scmp.lt.u32.totalorder %s501_s19, %s681_s4 }
  0x49   :  { %p507_p6 = pnand %p505_p5, %p502_p4 }
  0x4b   :  { %510 = shalt.err (!%p507_p6)
}
  0x4c   :  { %s511_s26 = scalar_lea.vmem %s62_s16, 2048  ;;  %p516_p8 = scmp.lt.s32.totalorder %s62_s16, %s62_s16 }
  0x4d   :  { %p512_p7 = scmp.ne.s32.totalorder %s62_s16, %s511_s26  ;;  %p517_p9 = scmp.lt.s32.totalorder %s511_s26, %s511_s26 }
  0x4f   :  { %p518_p10 = por %p517_p9, %p516_p8 }
  0x51   :  { %p519_p11 = pnand %p518_p10, %p512_p7 }
  0x53   :  { %522 = shalt.err (!%p519_p11)
}
  0x54   :  { %67 = dma.hbm_to_vmem [thread:$0]  %s681_s4, 2048, %s62_s16, [#allocation10], %s557_s0, %s557_s0, %s558_s13  }
  0x55   :  { %545 = dma.done.wait [#allocation4], 128  }
  0x56   :  { %546 = vsyncadd [#allocation4], 4294967168 }
  0x57   :  { %547 = dma.done.wait [#allocation7], 384  }
  0x58   :  { %548 = vsyncadd [#allocation7], 4294966912 }
  0x59   :  { %549 = dma.done.wait [#allocation10], 2064  }
  0x5a   :  { %550 = vsyncadd [#allocation10], 4294965232  ;;  %v560_v0 = vmov 0.0|0.0   ;;  %vm561_vm0 = vmmov 0   ;;  %v562_v1 = vmov 0.0   ;;  %v563_v2 = vmov 0  }
  0x5b   :  { %371 = vmatprep.subr.bf16.mxu0 %v560_v0  ;;  %333 = vmatprep.mubr.msk.f32.mxu0 %vm561_vm0, %v562_v1  ;;  %v90_v3 = vld [vmem:[#allocation8] sm:$0xff]  ;;  %v91_v4 = vld [vmem:[#allocation8 + $0x8] sm:$0xff]  ;;  %v166_v6 = vld [vmem:[#allocation6] sm:$0xff]  ;;  %vm92_vm1 = vcmask 130048   ;;  %vm87_vm2 = vcmask 31744   ;;  %v282_v46 = vlaneseq  ;;  %s564_s4 = smov [#allocation12]  }
  0x5c   :  { %410 = vset.pattern.permute.xlu0 %v563_v2  ;;  %374 = vmatprep.subr.bf16.mxu1 %v560_v0  ;;  %v372_v5 = vpack.c.bf16 %v91_v4, %v90_v3  ;;  %v185_v7 = vld [vmem:[#allocation11] sm:$0xff]  ;;  %v186_v8 = vld [vmem:[#allocation11 + $0x8] sm:$0xff]  ;;  %v187_v10 = vld [vmem:[#allocation11 + $0x10] sm:$0xff]  ;;  %88 = vst.msk [vmem:[#allocation2] sm:$0xff] %vm87_vm2, %v562_v1  ;;  %s296_s27 = sshll.u32 %s564_s4, 4  ;;  %vm288_vm3 = vcmask 57344   ;;  %s297_s27 = int_to_ptr.vmem [resolvable:$true] %s296_s27 }
  0x5d   :  { %368 = vmatprep.mubr.msk.f32.mxu1 %vm561_vm0, %v562_v1  ;;  %169 = vperm.xlu0 %410, %v166_v6   ;;  %v375_v9 = vpack.c.bf16 %v186_v8, %v185_v7  ;;  %v188_v11 = vld [vmem:[#allocation11 + $0x18] sm:$0xff]  ;;  %v189_v14 = vld [vmem:[#allocation11 + $0x20] sm:$0xff]  ;;  %v190_v15 = vld [vmem:[#allocation11 + $0x28] sm:$0xff]  ;;  %v283_v47 = vand.u32 127, %v282_v46  ;;  %v285_v48 = vshrl.u32 %v282_v46, 7  ;;  %s523_s28 = scalar_lea.vmem %s297_s27, 16  ;;  %p528_p13 = scmp.lt.s32.totalorder %s297_s27, %s297_s27 }
  0x5e   :  { %373 = vmatpush3.bf16.msra.mxu0 %v372_v5  ;;  %v89_v12 = vld [vmem:[#allocation3] sm:$0xff]  ;;  %v378_v13 = vpack.c.bf16 %v188_v11, %v187_v10  ;;  %v381_v16 = vpack.c.bf16 %v190_v15, %v189_v14  ;;  %v191_v17 = vld [vmem:[#allocation11 + $0x30] sm:$0xff]  ;;  %v194_v21 = vld [vmem:[#allocation11 + $0x48] sm:$0xff]  ;;  %p524_p12 = scmp.ne.s32.totalorder %s297_s27, %s523_s28  ;;  %s527_s3 = scalar_lea.vmem %s297_s27, 32 }
  0x5f   :  { %376 = vmatpush3.bf16.msra.mxu1 %v375_v9  ;;  %v192_v18 = vld [vmem:[#allocation11 + $0x38] sm:$0xff]  ;;  %v193_v20 = vld [vmem:[#allocation11 + $0x40] sm:$0xff]  ;;  %v195_v23 = vld [vmem:[#allocation11 + $0x50] sm:$0xff]  ;;  %v286_v49 = vsub.s32 %v283_v47, %v285_v48  ;;  %p529_p0 = scmp.lt.s32.totalorder %s527_s3, %s523_s28 }
  0x60   :  { %377 = vmatprep.subr.bf16.mxu1 %v560_v0  ;;  %v384_v19 = vpack.c.bf16 %v192_v18, %v191_v17  ;;  %v387_v22 = vpack.c.bf16 %v194_v21, %v193_v20  ;;  %v196_v24 = vld [vmem:[#allocation11 + $0x58] sm:$0xff]  ;;  %v197_v26 = vld [vmem:[#allocation11 + $0x60] sm:$0xff]  ;;  %v198_v27 = vld [vmem:[#allocation11 + $0x68] sm:$0xff] }
  0x61   :  { %334 = vmatmul.mubr.msk.f32.vlgmr.msra.gmra.mrb[0].mxu0 %vm92_vm1, %v89_v12  ;;  %v390_v25 = vpack.c.bf16 %v196_v24, %v195_v23  ;;  %v393_v28 = vpack.c.bf16 %v198_v27, %v197_v26  ;;  %v199_v29 = vld [vmem:[#allocation11 + $0x70] sm:$0xff]  ;;  %v200_v30 = vld [vmem:[#allocation11 + $0x78] sm:$0xff]  ;;  %p530_p1 = por %p529_p0, %p528_p13 }
  0x62   :  { %v396_v31 = vpack.c.bf16 %v200_v30, %v199_v29  ;;  %v308_v34 = vld [vmem:[#allocation9] ss:$0 sm:$0xff] }
  0x63   :  { %379 = vmatpush3.bf16.msra.mxu1 %v378_v13  ;;  %v201_v40 = vld [vmem:[#allocation2] sm:$0xff]  ;;  %p531_p2 = pnand %p530_p1, %p524_p12 }
  0x64   :  { %380 = vmatprep.subr.bf16.mxu1 %v560_v0 }
  0x67   :  { %382 = vmatpush3.bf16.msra.mxu1 %v381_v16 }
  0x68   :  { %383 = vmatprep.subr.bf16.mxu1 %v560_v0 }
  0x6b   :  { %385 = vmatpush3.bf16.msra.mxu1 %v384_v19 }
  0x6c   :  { %386 = vmatprep.subr.bf16.mxu1 %v560_v0 }
  0x6f   :  { %388 = vmatpush3.bf16.msra.mxu1 %v387_v22 }
  0x70   :  { %389 = vmatprep.subr.bf16.mxu1 %v560_v0 }
  0x73   :  { %391 = vmatpush3.bf16.msra.mxu1 %v390_v25 }
  0x74   :  { %392 = vmatprep.subr.bf16.mxu1 %v560_v0 }
  0x77   :  { %394 = vmatpush3.bf16.msra.mxu1 %v393_v28 }
  0x78   :  { %395 = vmatprep.subr.bf16.mxu1 %v560_v0 }
  0x7b   :  { %397 = vmatpush3.bf16.msra.mxu1 %v396_v31 }
  0xdc   :  { %v170_v32 = vpop.permute.xlu0 %169 }
 0x134   :  { %v162_v33 = vpop.f32.mrb[0].mxu0 }
 0x135   :  { %v172_v35 = vsub.f32 %v162_v33, %v170_v32  ;;  %v335_v36 = vpop.f32.mrb[1].mxu0 }
 0x137   :  { %v180_v37 = vsub.f32 %v172_v35, %v308_v34 }
 0x139   :  { %v181_v38 = vmul.f32 1.442695, %v180_v37 }
 0x13b   :  { %411 = vpow2.f32 %v181_v38 }
 0x145   :  { %v412_v39 = vpop.eup %411 }
 0x146   :  { %369 = vmatmul.mubr.f32.vlgmr.msra.gmra.mrb[0].mxu1 %v412_v39 }
 0x219   :  { %v268_v41 = vpop.f32.mrb[0].mxu1 }
 0x21a   :  { %v272_v42 = vadd.f32 %v268_v41, %v201_v40  ;;  %v370_v43 = vpop.f32.mrb[1].mxu1 }
 0x21c   :  { %274 = vst.msk [vmem:[#allocation2] sm:$0xff] %vm87_vm2, %v272_v42 }
 0x223   :  { %v278_v44 = vld [vmem:[#allocation2] sm:$0xff] }
 0x224   :  { %v279_v45 = vsel %vm87_vm2, %v278_v44, -inf }
 0x225   :  { %280 = vmax.index.xlane.f32.xlu0 %v279_v45 }
 0x2b2   :  { %v281_v50 = vpop.xlane.xlu0 %280 }
 0x2b3   :  { %v287_v51 = vrot.slane %v281_v50, %v286_v49 }
 0x2b5   :  { %289 = vst.msk [vmem:[#allocation12] sm:$0x1] %vm288_vm3, %v287_v51 }
 0x2b6   :  { %534 = shalt.err (!%p531_p2)
}
 0x2b7   :  { %s535_s30 = scalar_lea.hbm %s682_s5, 16 }
 0x2b8   :  { %p536_p3 = scmp.ne.s32.totalorder %s682_s5, %s535_s30  ;;  %p539_p4 = scmp.lt.u32.totalorder %s535_s30, %s682_s5 }
 0x2ba   :  { %p541_p5 = pnand %p539_p4, %p536_p3 }
 0x2bc   :  { %544 = shalt.err (!%p541_p5)
}
 0x2bd   :  { %299 = dma.vmem_to_hbm [thread:$0]  %s297_s27, 16, %s682_s5, [#allocation5]  }
 0x2be   :  { %551 = dma.done.wait [#allocation5], 16  }
 0x2bf   :  { %552 = vsyncadd [#allocation5], 4294967280 }
 0x2c0   :  { %303 = vsyncpa [#allocation4], 1 }
 0x2c1   :  { %304 = vsyncpa [#allocation7], 1 }
 0x2c2   :  { %305 = vsyncpa [#allocation10], 1 }
 0x2c3   :  { %306 = vsyncpa [#allocation5], 1 }

</bundles_post_ra>
